<compile_context>
chip_gen: v5e
topology: v5e:2x2
jax: 0.10.0
libtpu: 0.0.40
codegen_flags: <defaults>
</compile_context>

<pallas_src>
import functools
import math

import jax
import jax.numpy as jnp
from jax.experimental import pallas as pl
from jax.experimental.pallas import tpu as pltpu

LEAKY_SLOPE = 0.01   # torch.nn.LeakyReLU default
LANE = 128


# ----------------------------- Pallas kernel --------------------------------
def _mlp_kernel(x_ref, a_ref, p_ref, w_ref, b_ref, wo_ref, bo_ref, o_ref,
                *, n_layers, dx, da):
    # x_ref : (tm, dx)        f32   repeated context rows
    # a_ref : (tm, dap)       bf16  action rows (zero-padded to dap)
    # p_ref : (dap, Fp)       bf16  constant 0/1 placement matrix (resident)
    # w_ref : (L, Fp, Fp)     bf16  Linear weights, y = x @ W + b (resident)
    # b_ref : (L, 1, Fp)      f32   Linear biases (resident)
    # wo_ref: (1, Fp)         f32   final Linear(F, 1) weight row (resident)
    # bo_ref: (1,)            f32   final bias (SMEM scalar)
    # o_ref : (1, 1, tm)      f32   lane-dense rewards for this row tile
    fp = p_ref.shape[-1]

    # ---- fused featurization: feat[:, k*da + j] = xe_k * a_j, xe = (1, x) ----
    # P replicates a_j into lane k*da + j for every block k (one tiny MXU push
    # per 8 rows); block masks built from a 2-D iota select which x scales it.
    a_tiled = jnp.dot(a_ref[...], p_ref[...],
                      preferred_element_type=jnp.float32)            # (tm, Fp)
    lane = jax.lax.broadcasted_iota(jnp.int32, (1, fp), 1)

    def block_mask(k):        # 1.0 on lanes of interaction block k, else 0.0
        return ((lane >= k * da) & (lane < (k + 1) * da)).astype(jnp.float32)

    x = x_ref[...]                                                    # (tm, dx)
    xe_rep = block_mask(0)                                            # 'a' block
    for k in range(dx):                                               # 'xa' blocks
        xe_rep = xe_rep + x[:, k:k + 1] * block_mask(k + 1)
    h_lo = (a_tiled * xe_rep).astype(jnp.bfloat16)                    # (tm, Fp)

    # ---- hidden Linear + LeakyReLU stack (bf16 MXU, f32 epilogue) ----
    for l in range(n_layers):             # static unroll; n_layers is tiny
        acc = jnp.dot(h_lo, w_ref[l],
                      preferred_element_type=jnp.float32) + b_ref[l]
        h_hi = jnp.maximum(acc, LEAKY_SLOPE * acc)                    # LeakyReLU
        h_lo = h_hi.astype(jnp.bfloat16)

    # ---- final Linear(Fp -> 1): VPU multiply + lane reduce, lane-dense store ----
    r = jnp.sum(h_hi * wo_ref[...], axis=-1) + bo_ref[0]              # (tm,)
    o_ref[...] = r.reshape(o_ref.shape)


def _pick_tm(n, tm_max=2048):
    """Row tile: as large as possible, but keep >= 2 tiles (v7x megacore)."""
    half = -(-n // 2)
    tm = min(tm_max, -(-half // 16) * 16)    # multiple of 16 (bf16 sublane tiling)
    return max(16, tm)


def _vmem_limit_bytes(tm, dx, dap, fp, n_layers):
    """Scoped-VMEM request derived from the real footprint, with headroom."""
    def lane_pad(d):
        return -(-d // LANE) * LANE
    streamed = tm * lane_pad(dx) * 4 + tm * lane_pad(dap) * 2      # one x + a buffer
    resident = (dap * fp * 2                                       # P
                + n_layers * fp * fp * 2                           # W (bf16)
                + n_layers * 8 * fp * 4                            # biases
                + 2 * 8 * fp * 4)                                  # wo + slack
    out_buf = 8 * max(tm, LANE) * 4
    live = 6 * tm * fp * 4                                         # feat/acc/h temps
    est = 2 * streamed + resident + 2 * out_buf + live
    return int(min(64 * 1024 * 1024, max(32 * 1024 * 1024, 2 * est)))


@functools.partial(jax.jit, static_argnames=("tm_max",))
def mlp_reward_forward(context, actions, p, w, b, wo, bo, *, tm_max=2048):
    """MlpRewardModel forward: reward for every (context, action) pair.

    context: [B, dx] f32, actions: [B, A, da] f32.  Returns [B*A, 1] f32 with
    row order (b, a) = (0,0), (0,1), ...  p/w/b/wo/bo come from pack_params().
    """
    context = context.astype(jnp.float32)
    actions = actions.astype(jnp.float32)
    B, dx = context.shape
    _, A, da = actions.shape
    dap, fp = p.shape
    n_layers = int(w.shape[0])
    assert n_layers >= 1
    n = B * A

    # Tiny per-row raw inputs; the [N, F] feature matrix is built in-kernel.
    a_flat = actions.reshape(n, da)
    if dap > da:
        a_flat = jnp.pad(a_flat, ((0, 0), (0, dap - da)))
    a_flat = a_flat.astype(jnp.bfloat16)
    x_rep = jnp.repeat(context, A, axis=0)                           # [N, dx]

    tm = _pick_tm(n, tm_max)
    grid = -(-n // tm)
    n_pad = grid * tm
    if n_pad != n:                        # padded rows are sliced off at the end
        a_flat = jnp.pad(a_flat, ((0, n_pad - n), (0, 0)))
        x_rep = jnp.pad(x_rep, ((0, n_pad - n), (0, 0)))

    kernel = functools.partial(_mlp_kernel, n_layers=n_layers, dx=dx, da=da)
    out = pl.pallas_call(
        kernel,
        out_shape=jax.ShapeDtypeStruct((grid, 1, tm), jnp.float32),
        grid_spec=pltpu.PrefetchScalarGridSpec(
            num_scalar_prefetch=0,
            grid=(grid,),
            in_specs=[
                # streamed row tiles (default double-buffered)
                pl.BlockSpec((tm, dx), lambda i: (i, 0)),
                pl.BlockSpec((tm, dap), lambda i: (i, 0)),
                # resident operands: constant index map + single buffer
                pl.BlockSpec((dap, fp), lambda i: (0, 0),
                             pipeline_mode=pl.Buffered(1)),
                pl.BlockSpec((n_layers, fp, fp), lambda i: (0, 0, 0),
                             pipeline_mode=pl.Buffered(1)),
                pl.BlockSpec((n_layers, 1, fp), lambda i: (0, 0, 0),
                             pipeline_mode=pl.Buffered(1)),
                pl.BlockSpec((1, fp), lambda i: (0, 0),
                             pipeline_mode=pl.Buffered(1)),
                pl.BlockSpec(memory_space=pltpu.MemorySpace.SMEM),
            ],
            out_specs=pl.BlockSpec((1, 1, tm), lambda i: (i, 0, 0)),
        ),
        compiler_params=pltpu.CompilerParams(
            dimension_semantics=("parallel",),       # megacore-shards row tiles
            vmem_limit_bytes=_vmem_limit_bytes(tm, dx, dap, fp, n_layers),
        ),
    )(x_rep, a_flat, p, w, b, wo, bo)
    return out.reshape(n_pad)[:n].reshape(n, 1)


# ------------------------- parameter init / packing -------------------------
def init_linear_params(key, n_layers, f):
    """torch.nn.Linear-style U(-1/sqrt(fan_in), 1/sqrt(fan_in)) params, f32.

    Weights are stored in 'y = x @ W' orientation (i.e. torch W transposed).
    """
    keys = jax.random.split(key, 2 * n_layers + 2)
    bound = 1.0 / math.sqrt(f)
    wts, bs = [], []
    for l in range(n_layers):
        wts.append(jax.random.uniform(keys[2 * l], (f, f), jnp.float32, -bound, bound))
        bs.append(jax.random.uniform(keys[2 * l + 1], (f,), jnp.float32, -bound, bound))
    wo_vec = jax.random.uniform(keys[-2], (f,), jnp.float32, -bound, bound)
    bo = jax.random.uniform(keys[-1], (1,), jnp.float32, -bound, bound)
    return wts, bs, wo_vec, bo


def pack_params(wts, bs, wo_vec, bo, *, dx, da, dap, fp):
    """Zero-pad params to the lane-padded width Fp and build the placement matrix P."""
    f = da * (dx + 1)
    n_layers = len(wts)
    w = jnp.zeros((n_layers, fp, fp), jnp.float32)
    b = jnp.zeros((n_layers, 1, fp), jnp.float32)
    for l in range(n_layers):
        w = w.at[l, :f, :f].set(wts[l])
        b = b.at[l, 0, :f].set(bs[l])
    wo = jnp.zeros((1, fp), jnp.float32).at[0, :f].set(wo_vec)
    # P[j, k*da + j] = 1: scatters action component j into every interaction block k.
    rows = jnp.arange(dap)[:, None]
    cols = jnp.arange(fp)[None, :]
    p = ((cols % da == rows) & (cols < f) & (rows < da)).astype(jnp.bfloat16)
    return p, w.astype(jnp.bfloat16), b, wo, jnp.asarray(bo, jnp.float32)


# ------------------------------ references ----------------------------------
def featurize(context, actions):
    """coba InteractionsEncoder(['a','xa']): per (x, a) row -> concat(a, outer(x, a))."""
    B, dx = context.shape
    _, A, da = actions.shape
    a_flat = actions.reshape(B * A, da)
    x_rep = jnp.repeat(context, A, axis=0)
    xa = (x_rep[:, :, None] * a_flat[:, None, :]).reshape(B * A, dx * da)
    return jnp.concatenate([a_flat, xa], axis=1).astype(jnp.float32)


def reference_forward_kernel_math(context, actions, p, w, b, wo, bo, *, n_layers, dx, da):
    """Pure-JAX mirror of the kernel's exact math (bf16 MXU inputs, f32 epilogue)."""
    B = context.shape[0]
    A = actions.shape[1]
    n = B * A
    dap, fp = p.shape
    a_flat = jnp.pad(actions.reshape(n, da), ((0, 0), (0, dap - da))).astype(jnp.bfloat16)
    x_rep = jnp.repeat(context, A, axis=0)
    a_tiled = jnp.dot(a_flat, p, preferred_element_type=jnp.float32)
    lane = jnp.arange(fp)[None, :]

    def block_mask(k):
        return ((lane >= k * da) & (lane < (k + 1) * da)).astype(jnp.float32)

    xe_rep = block_mask(0)
    for k in range(dx):
        xe_rep = xe_rep + x_rep[:, k:k + 1] * block_mask(k + 1)
    h_lo = (a_tiled * xe_rep).astype(jnp.bfloat16)
    for l in range(n_layers):
        acc = jnp.dot(h_lo, w[l], preferred_element_type=jnp.float32) + b[l]
        h = jnp.maximum(acc, LEAKY_SLOPE * acc)
        h_lo = h.astype(jnp.bfloat16)
    return jnp.sum(h * wo, axis=-1, keepdims=True) + bo[0]


def reference_forward_f32(context, actions, wts, bs, wo_vec, bo):
    """f32 torch-equivalent forward (bounds the bf16 quantization drift)."""
    h = featurize(context, actions)
    for wt, bv in zip(wts, bs):
        pre = jnp.dot(h, wt, precision=jax.lax.Precision.HIGHEST) + bv
        h = jnp.maximum(pre, LEAKY_SLOPE * pre)
    return (jnp.dot(h, wo_vec, precision=jax.lax.Precision.HIGHEST) + bo[0])[:, None]


# --------------------------------- tests -------------------------------------
def run_case(key, B, A, dx, da, n_layers):
    k_ctx, k_act, k_par = jax.random.split(key, 3)
    context = jax.random.normal(k_ctx, (B, dx), jnp.float32)
    actions = jax.random.normal(k_act, (B, A, da), jnp.float32)

    f = da * (dx + 1)                 # InteractionsEncoder(['a','xa']) feature width
    fp = -(-f // LANE) * LANE         # lane-padded hidden width (if the width were a
                                      # real hyperparameter, multiples of 256 use the
                                      # v6e/v7x MXU better)
    dap = -(-da // 8) * 8             # sublane-padded raw action width

    wts, bs, wo_vec, bo = init_linear_params(k_par, n_layers, f)
    p, w, b, wo, bo_p = pack_params(wts, bs, wo_vec, bo, dx=dx, da=da, dap=dap, fp=fp)

    out = jax.block_until_ready(mlp_reward_forward(context, actions, p, w, b, wo, bo_p))
    assert out.shape == (B * A, 1)

    # (1) exact-math reference (same bf16/f32 ordering as the kernel): tight check.
    ref_k = reference_forward_kernel_math(context, actions, p, w, b, wo, bo_p,
                                          n_layers=n_layers, dx=dx, da=da)
    assert jnp.allclose(out, ref_k, atol=1e-4, rtol=1e-4), float(jnp.max(jnp.abs(out - ref_k)))

    # (2) f32 torch-equivalent forward: bf16 weight/activation quantization budget.
    ref32 = reference_forward_f32(context, actions, wts, bs, wo_vec, bo)
    err = float(jnp.max(jnp.abs(out - ref32)))
    tol = 0.05 * float(jnp.max(jnp.abs(ref32))) + 0.05
    assert err < tol, (err, tol)


if __name__ == "__main__":
    key = jax.random.PRNGKey(0)
    k1, k2 = jax.random.split(key)
    # case 1: module-implied small shapes (4 contexts of dim 4, 2 actions of dim 4)
    run_case(k1, B=4, A=2, dx=4, da=4, n_layers=2)
    # case 2: exercises grid=2 (two parallel row tiles), F=63 -> Fp=128 padding
    run_case(k2, B=16, A=40, dx=8, da=7, n_layers=3)
    print("KERNEL_OK")
</pallas_src>

<mosaic_0001>
module attributes {stable_mosaic.version = 11 : i64} {
  func.func @_mlp_kernel(%arg0: i32, %arg1: memref<16x4xf32, #tpu.memory_space<vmem>>, %arg2: memref<16x8xbf16, #tpu.memory_space<vmem>>, %arg3: memref<8x128xbf16, #tpu.memory_space<vmem>>, %arg4: memref<2x128x128xbf16, #tpu.memory_space<vmem>>, %arg5: memref<2x1x128xf32, #tpu.memory_space<vmem>>, %arg6: memref<1x128xf32, #tpu.memory_space<vmem>>, %arg7: memref<1xf32, #tpu.memory_space<smem>>, %arg8: memref<1x1x16xf32, #tpu.memory_space<vmem>>) attributes {dimension_semantics = [#tpu.dimension_semantics<parallel>], iteration_bounds = array<i64: 1>, scalar_prefetch = 0 : i64, scratch_operands = 0 : i64, tpu.core_type = #tpu.core_type<tc>, window_params = [{transform_indices = @transform_0, window_bounds = array<i64: 16, 4>}, {transform_indices = @transform_1, window_bounds = array<i64: 16, 8>}, {pipeline_mode = #tpu.pipeline_mode<synchronous>, transform_indices = @transform_2, window_bounds = array<i64: 8, 128>}, {pipeline_mode = #tpu.pipeline_mode<synchronous>, transform_indices = @transform_3, window_bounds = array<i64: 2, 128, 128>}, {pipeline_mode = #tpu.pipeline_mode<synchronous>, transform_indices = @transform_4, window_bounds = array<i64: 2, 1, 128>}, {pipeline_mode = #tpu.pipeline_mode<synchronous>, transform_indices = @transform_5, window_bounds = array<i64: 1, 128>}, {transform_indices = @transform_6, window_bounds = array<i64: 1>}, {transform_indices = @transform_7, window_bounds = array<i64: 1, 1, 16>}]} {
    %c0 = arith.constant 0 : index
    %c0_0 = arith.constant 0 : index
    %0 = vector.load %arg2[%c0, %c0_0] : memref<16x8xbf16, #tpu.memory_space<vmem>>, vector<16x8xbf16>
    %c0_1 = arith.constant 0 : index
    %c0_2 = arith.constant 0 : index
    %1 = vector.load %arg3[%c0_1, %c0_2] : memref<8x128xbf16, #tpu.memory_space<vmem>>, vector<8x128xbf16>
    %cst = arith.constant dense<0.000000e+00> : vector<16x128xf32>
    %2 = tpu.matmul %0, %1, %cst {dimension_numbers = #tpu.dot_dimension_numbers<[1], [0], [0], [1], [0, 0, 1, 1], [], []>} : vector<16x8xbf16>, vector<8x128xbf16>, vector<16x128xf32> -> vector<16x128xf32>
    %3 = tpu.iota {dimensions = array<i32: 1>} : vector<1x128xi32>
    %c0_3 = arith.constant 0 : index
    %c0_4 = arith.constant 0 : index
    %4 = vector.load %arg1[%c0_3, %c0_4] : memref<16x4xf32, #tpu.memory_space<vmem>>, vector<16x4xf32>
    %c0_i32 = arith.constant 0 : i32
    %5 = vector.broadcast %c0_i32 : i32 to vector<1x128xi32>
    %6 = arith.cmpi sge, %3, %5 : vector<1x128xi32>
    %c4_i32 = arith.constant 4 : i32
    %7 = vector.broadcast %c4_i32 : i32 to vector<1x128xi32>
    %8 = arith.cmpi slt, %3, %7 : vector<1x128xi32>
    %9 = arith.andi %6, %8 : vector<1x128xi1>
    %10 = arith.extui %9 : vector<1x128xi1> to vector<1x128xi32>
    %11 = arith.sitofp %10 : vector<1x128xi32> to vector<1x128xf32>
    %12 = vector.extract_strided_slice %4 {offsets = [0, 0], sizes = [16, 1], strides = [1, 1]} : vector<16x4xf32> to vector<16x1xf32>
    %c4_i32_5 = arith.constant 4 : i32
    %13 = vector.broadcast %c4_i32_5 : i32 to vector<1x128xi32>
    %14 = arith.cmpi sge, %3, %13 : vector<1x128xi32>
    %c8_i32 = arith.constant 8 : i32
    %15 = vector.broadcast %c8_i32 : i32 to vector<1x128xi32>
    %16 = arith.cmpi slt, %3, %15 : vector<1x128xi32>
    %17 = arith.andi %14, %16 : vector<1x128xi1>
    %18 = arith.extui %17 : vector<1x128xi1> to vector<1x128xi32>
    %19 = arith.sitofp %18 : vector<1x128xi32> to vector<1x128xf32>
    %20 = vector.broadcast %12 : vector<16x1xf32> to vector<16x128xf32>
    %21 = vector.broadcast %19 : vector<1x128xf32> to vector<16x128xf32>
    %22 = arith.mulf %20, %21 : vector<16x128xf32>
    %23 = vector.broadcast %11 : vector<1x128xf32> to vector<16x128xf32>
    %24 = arith.addf %23, %22 : vector<16x128xf32>
    %25 = vector.extract_strided_slice %4 {offsets = [0, 1], sizes = [16, 1], strides = [1, 1]} : vector<16x4xf32> to vector<16x1xf32>
    %c8_i32_6 = arith.constant 8 : i32
    %26 = vector.broadcast %c8_i32_6 : i32 to vector<1x128xi32>
    %27 = arith.cmpi sge, %3, %26 : vector<1x128xi32>
    %c12_i32 = arith.constant 12 : i32
    %28 = vector.broadcast %c12_i32 : i32 to vector<1x128xi32>
    %29 = arith.cmpi slt, %3, %28 : vector<1x128xi32>
    %30 = arith.andi %27, %29 : vector<1x128xi1>
    %31 = arith.extui %30 : vector<1x128xi1> to vector<1x128xi32>
    %32 = arith.sitofp %31 : vector<1x128xi32> to vector<1x128xf32>
    %33 = vector.broadcast %25 : vector<16x1xf32> to vector<16x128xf32>
    %34 = vector.broadcast %32 : vector<1x128xf32> to vector<16x128xf32>
    %35 = arith.mulf %33, %34 : vector<16x128xf32>
    %36 = arith.addf %24, %35 : vector<16x128xf32>
    %37 = vector.extract_strided_slice %4 {offsets = [0, 2], sizes = [16, 1], strides = [1, 1]} : vector<16x4xf32> to vector<16x1xf32>
    %c12_i32_7 = arith.constant 12 : i32
    %38 = vector.broadcast %c12_i32_7 : i32 to vector<1x128xi32>
    %39 = arith.cmpi sge, %3, %38 : vector<1x128xi32>
    %c16_i32 = arith.constant 16 : i32
    %40 = vector.broadcast %c16_i32 : i32 to vector<1x128xi32>
    %41 = arith.cmpi slt, %3, %40 : vector<1x128xi32>
    %42 = arith.andi %39, %41 : vector<1x128xi1>
    %43 = arith.extui %42 : vector<1x128xi1> to vector<1x128xi32>
    %44 = arith.sitofp %43 : vector<1x128xi32> to vector<1x128xf32>
    %45 = vector.broadcast %37 : vector<16x1xf32> to vector<16x128xf32>
    %46 = vector.broadcast %44 : vector<1x128xf32> to vector<16x128xf32>
    %47 = arith.mulf %45, %46 : vector<16x128xf32>
    %48 = arith.addf %36, %47 : vector<16x128xf32>
    %49 = vector.extract_strided_slice %4 {offsets = [0, 3], sizes = [16, 1], strides = [1, 1]} : vector<16x4xf32> to vector<16x1xf32>
    %c16_i32_8 = arith.constant 16 : i32
    %50 = vector.broadcast %c16_i32_8 : i32 to vector<1x128xi32>
    %51 = arith.cmpi sge, %3, %50 : vector<1x128xi32>
    %c20_i32 = arith.constant 20 : i32
    %52 = vector.broadcast %c20_i32 : i32 to vector<1x128xi32>
    %53 = arith.cmpi slt, %3, %52 : vector<1x128xi32>
    %54 = arith.andi %51, %53 : vector<1x128xi1>
    %55 = arith.extui %54 : vector<1x128xi1> to vector<1x128xi32>
    %56 = arith.sitofp %55 : vector<1x128xi32> to vector<1x128xf32>
    %57 = vector.broadcast %49 : vector<16x1xf32> to vector<16x128xf32>
    %58 = vector.broadcast %56 : vector<1x128xf32> to vector<16x128xf32>
    %59 = arith.mulf %57, %58 : vector<16x128xf32>
    %60 = arith.addf %48, %59 : vector<16x128xf32>
    %61 = arith.mulf %2, %60 : vector<16x128xf32>
    %62 = arith.truncf %61 : vector<16x128xf32> to vector<16x128xbf16>
    %c0_9 = arith.constant 0 : index
    %c0_10 = arith.constant 0 : index
    %c0_11 = arith.constant 0 : index
    %63 = vector.load %arg4[%c0_9, %c0_10, %c0_11] : memref<2x128x128xbf16, #tpu.memory_space<vmem>>, vector<1x128x128xbf16>
    %64 = vector.shape_cast %63 : vector<1x128x128xbf16> to vector<128x128xbf16>
    %cst_12 = arith.constant dense<0.000000e+00> : vector<16x128xf32>
    %65 = tpu.matmul %62, %64, %cst_12 {dimension_numbers = #tpu.dot_dimension_numbers<[1], [0], [0], [1], [0, 0, 1, 1], [], []>} : vector<16x128xbf16>, vector<128x128xbf16>, vector<16x128xf32> -> vector<16x128xf32>
    %c0_13 = arith.constant 0 : index
    %c0_14 = arith.constant 0 : index
    %c0_15 = arith.constant 0 : index
    %66 = vector.load %arg5[%c0_13, %c0_14, %c0_15] : memref<2x1x128xf32, #tpu.memory_space<vmem>>, vector<1x1x128xf32>
    %67 = vector.shape_cast %66 : vector<1x1x128xf32> to vector<1x128xf32>
    %68 = vector.broadcast %67 : vector<1x128xf32> to vector<16x128xf32>
    %69 = arith.addf %65, %68 : vector<16x128xf32>
    %cst_16 = arith.constant 0.00999999977 : f32
    %70 = vector.broadcast %cst_16 : f32 to vector<16x128xf32>
    %71 = arith.mulf %70, %69 : vector<16x128xf32>
    %72 = arith.maximumf %69, %71 : vector<16x128xf32>
    %73 = arith.truncf %72 : vector<16x128xf32> to vector<16x128xbf16>
    %c1 = arith.constant 1 : index
    %c0_17 = arith.constant 0 : index
    %c0_18 = arith.constant 0 : index
    %74 = vector.load %arg4[%c1, %c0_17, %c0_18] : memref<2x128x128xbf16, #tpu.memory_space<vmem>>, vector<1x128x128xbf16>
    %75 = vector.shape_cast %74 : vector<1x128x128xbf16> to vector<128x128xbf16>
    %cst_19 = arith.constant dense<0.000000e+00> : vector<16x128xf32>
    %76 = tpu.matmul %73, %75, %cst_19 {dimension_numbers = #tpu.dot_dimension_numbers<[1], [0], [0], [1], [0, 0, 1, 1], [], []>} : vector<16x128xbf16>, vector<128x128xbf16>, vector<16x128xf32> -> vector<16x128xf32>
    %c1_20 = arith.constant 1 : index
    %c0_21 = arith.constant 0 : index
    %c0_22 = arith.constant 0 : index
    %77 = vector.load %arg5[%c1_20, %c0_21, %c0_22] : memref<2x1x128xf32, #tpu.memory_space<vmem>>, vector<1x1x128xf32>
    %78 = vector.shape_cast %77 : vector<1x1x128xf32> to vector<1x128xf32>
    %79 = vector.broadcast %78 : vector<1x128xf32> to vector<16x128xf32>
    %80 = arith.addf %76, %79 : vector<16x128xf32>
    %cst_23 = arith.constant 0.00999999977 : f32
    %81 = vector.broadcast %cst_23 : f32 to vector<16x128xf32>
    %82 = arith.mulf %81, %80 : vector<16x128xf32>
    %83 = arith.maximumf %80, %82 : vector<16x128xf32>
    %c0_24 = arith.constant 0 : index
    %c0_25 = arith.constant 0 : index
    %84 = vector.load %arg6[%c0_24, %c0_25] : memref<1x128xf32, #tpu.memory_space<vmem>>, vector<1x128xf32>
    %85 = vector.broadcast %84 : vector<1x128xf32> to vector<16x128xf32>
    %86 = arith.mulf %83, %85 : vector<16x128xf32>
    %cst_26 = arith.constant dense<0.000000e+00> : vector<16xf32>
    %87 = vector.multi_reduction <add>, %86, %cst_26 [1] : vector<16x128xf32> to vector<16xf32>
    %c0_27 = arith.constant 0 : index
    %88 = memref.load %arg7[%c0_27] : memref<1xf32, #tpu.memory_space<smem>>
    %89 = vector.broadcast %88 : f32 to vector<16xf32>
    %90 = arith.addf %87, %89 : vector<16xf32>
    %91 = vector.shape_cast %90 : vector<16xf32> to vector<1x1x16xf32>
    %c0_28 = arith.constant 0 : index
    %c0_29 = arith.constant 0 : index
    %c0_30 = arith.constant 0 : index
    %92 = vector.load %arg8[%c0_28, %c0_29, %c0_30] : memref<1x1x16xf32, #tpu.memory_space<vmem>>, vector<1x1x16xf32>
    tpu.vector_store %arg8[%c0_28, %c0_29, %c0_30], %91 {strides = array<i32>} : memref<1x1x16xf32, #tpu.memory_space<vmem>>, vector<1x1x16xf32>,
    return
  }
  func.func @transform_0(%arg0: i32) -> (i32, i32) {
    %c0_i32 = arith.constant 0 : i32
    %c0_i32_0 = arith.constant 0 : i32
    return %arg0, %c0_i32 : i32, i32
  }
  func.func @transform_1(%arg0: i32) -> (i32, i32) {
    %c0_i32 = arith.constant 0 : i32
    %c0_i32_0 = arith.constant 0 : i32
    return %arg0, %c0_i32 : i32, i32
  }
  func.func @transform_2(%arg0: i32) -> (i32, i32) {
    %c0_i32 = arith.constant 0 : i32
    %c0_i32_0 = arith.constant 0 : i32
    %c0_i32_1 = arith.constant 0 : i32
    return %c0_i32, %c0_i32_0 : i32, i32
  }
  func.func @transform_3(%arg0: i32) -> (i32, i32, i32) {
    %c0_i32 = arith.constant 0 : i32
    %c0_i32_0 = arith.constant 0 : i32
    %c0_i32_1 = arith.constant 0 : i32
    %c0_i32_2 = arith.constant 0 : i32
    return %c0_i32, %c0_i32_0, %c0_i32_1 : i32, i32, i32
  }
  func.func @transform_4(%arg0: i32) -> (i32, i32, i32) {
    %c0_i32 = arith.constant 0 : i32
    %c0_i32_0 = arith.constant 0 : i32
    %c0_i32_1 = arith.constant 0 : i32
    %c0_i32_2 = arith.constant 0 : i32
    return %c0_i32, %c0_i32_0, %c0_i32_1 : i32, i32, i32
  }
  func.func @transform_5(%arg0: i32) -> (i32, i32) {
    %c0_i32 = arith.constant 0 : i32
    %c0_i32_0 = arith.constant 0 : i32
    %c0_i32_1 = arith.constant 0 : i32
    return %c0_i32, %c0_i32_0 : i32, i32
  }
  func.func @transform_6(%arg0: i32) -> i32 {
    %c0_i32 = arith.constant 0 : i32
    %c0_i32_0 = arith.constant 0 : i32
    return %c0_i32 : i32
  }
  func.func @transform_7(%arg0: i32) -> (i32, i32, i32) {
    %c0_i32 = arith.constant 0 : i32
    %c0_i32_0 = arith.constant 0 : i32
    %c0_i32_1 = arith.constant 0 : i32
    return %arg0, %c0_i32, %c0_i32_0 : i32, i32, i32
  }
}

</mosaic_0001>

<bundles_post_ra>
// kernel: mlp_reward_forward.1
= control target key start
LH: loop header
LB: loop body
LE: loop exit
PB: predicated region body
PF: predicated region fallthrough
CT: control target
= control target key end

     0   :  { %13 = vsyncpa [#allocation4], 0  ;;  %s494_s27 = smov [#allocation3]   ;;  %s495_s29 = smov 64   ;;  %s585_s0 = inlined_call_operand.vmem [shape: f32[16,4], index: 0, kind: input, shape index: {}]   ;;  %s586_s1 = inlined_call_operand.vmem [shape: bf16[16,8], index: 1, kind: input, shape index: {}]   ;;  %s587_s2 = inlined_call_operand.vmem [shape: bf16[8,128], index: 2, kind: input, shape index: {}]   ;;  %s588_s3 = inlined_call_operand.hbm [shape: bf16[2,128,128], index: 3, kind: input, shape index: {}]   ;;  %s589_s4 = inlined_call_operand.vmem [shape: f32[2,1,128], index: 4, kind: input, shape index: {}]   ;;  %s590_s5 = inlined_call_operand.vmem [shape: f32[1,128], index: 5, kind: input, shape index: {}]   ;;  %s591_s6 = inlined_call_operand.<no memory space> [shape: f32[1], index: 6, kind: input, shape index: {}]   ;;  %s592_s7 = inlined_call_operand.vmem [shape: f32[1,1,16], index: 7, kind: output, shape index: {}]  }
   0x1   :  { %s24_s26 = sshll.u32 %s588_s3, 4  ;;  %s26_s28 = sshll.u32 %s494_s27, 4  ;;  %s25_s26 = int_to_ptr.hbm [resolvable:$true] %s24_s26  ;;  %s27_s28 = int_to_ptr.vmem [resolvable:$true] %s26_s28 }
   0x2   :  { %s496_s30 = smov 4  }
   0x3   :  { %32 = dma.hbm_to_vmem [thread:$0]  %s25_s26, 2048, %s27_s28, [#allocation4], %s495_s29, %s495_s29, %s496_s30  }
   0x4   :  { %492 = dma.done.wait [#allocation4], 2048  }
   0x5   :  { %493 = vsyncadd [#allocation4], 4294965248  ;;  %v497_v0 = vmov 1   ;;  %v498_v1 = vmov 0   ;;  %v499_v2 = vmov 2   ;;  %vm56_vm0 = vcmask 1043456  }
   0x6   :  { %461 = vset.pattern.permute.xlu1 %v497_v0  ;;  %460 = vset.pattern.permute.xlu0 %v498_v1  ;;  %v76_v3 = vld [vmem:[%s585_s0] sm:$0xff]  ;;  %v443_v7 = vld [vmem:[#allocation3 + $0x38] sm:$0xff]  ;;  %vm52_vm1 = vcmask 64512   ;;  %v77_v8 = vld [vmem:[%s585_s0 + $0x8] sm:$0xff]  ;;  %v500_v9 = vmov 3   ;;  %v74_v16 = vlaneseq  ;;  %v501_v24 = vmov 0.0  }
   0x7   :  { %462 = vset.pattern.permute.xlu2 %v499_v2  ;;  %v46_v4 = vld [vmem:[%s587_s2] sm:$0xf]  ;;  %108 = vperm.xlu1 %461, %v76_v3   ;;  %v442_v10 = vld [vmem:[#allocation3 + $0x30] sm:$0xff]  ;;  %v441_v11 = vld [vmem:[#allocation3 + $0x28] sm:$0xff]  ;;  %vm350_vm15 = vcmask 130112  }
   0x8   :  { %90 = vperm.xlu0 %460, %v76_v3   ;;  %v58_v5 = vsel %vm56_vm0, %v46_v4, 0  ;;  %v435_v6 = vld [vmem:[%s586_s1] sm:$0xff]  ;;  %125 = vperm.xlu2 %462, %v76_v3   ;;  %v439_v13 = vld [vmem:[#allocation3 + $0x18] sm:$0xff]  ;;  %v438_v14 = vld [vmem:[#allocation3 + $0x10] sm:$0xff]  ;;  %v557_v18 = vand.u32 127, %v74_v16  ;;  %vm353_vm0 = vcmask 122880  }
   0x9   :  { %67 = vmatpush.bf16.msra.mxu0 %v58_v5  ;;  %224 = vmatpush.bf16.msra.mxu1 %v443_v7  ;;  %v440_v12 = vld [vmem:[#allocation3 + $0x20] sm:$0xff]  ;;  %v437_v15 = vld [vmem:[#allocation3 + $0x8] sm:$0xff]  ;;  %v451_v19 = vld [vmem:[#allocation3 + $0x78] sm:$0xff] }
   0xa   :  { %v436_v17 = vld [vmem:[#allocation3] sm:$0xff]  ;;  %vm83_vm2 = vcmp.ge.s32.totalorder %v557_v18, 4  ;;  %vm84_vm3 = vcmp.lt.s32.totalorder %v557_v18, 8  ;;  %313 = vmatpush.bf16.msra.mxu2 %v451_v19  ;;  %v450_v20 = vld [vmem:[#allocation3 + $0x70] sm:$0xff]  ;;  %vm102_vm5 = vcmp.ge.s32.totalorder %v557_v18, 8  ;;  %vm103_vm6 = vcmp.lt.s32.totalorder %v557_v18, 12 }
   0xb   :  { %vm85_vm4 = vmand %vm83_vm2, %vm84_vm3  ;;  %v449_v23 = vld [vmem:[#allocation3 + $0x68] sm:$0xff]  ;;  %vm79_vm8 = vcmp.lt.s32.totalorder %v557_v18, 4  ;;  %vm119_vm9 = vcmp.ge.s32.totalorder %v557_v18, 12  ;;  %vm120_vm10 = vcmp.lt.s32.totalorder %v557_v18, 16  ;;  %v448_v28 = vld [vmem:[#allocation3 + $0x60] sm:$0xff]  ;;  %vm136_vm12 = vcmp.ge.s32.totalorder %v557_v18, 16 }
   0xc   :  { %364 = vmatmul.msk.bf16.vlgmr.msra.gmra.mxu0 %vm52_vm1, %v435_v6  ;;  %v366_v25 = vsel %vm85_vm4, 1.0, %v501_v24  ;;  %vm104_vm7 = vmand %vm102_vm5, %vm103_vm6  ;;  %v365_v30 = vsel %vm79_vm8, 1.0, %v501_v24  ;;  %vm137_vm13 = vcmp.lt.s32.totalorder %v557_v18, 20  ;;  %v447_v58 = vld [vmem:[#allocation3 + $0x58] sm:$0xff]  ;;  %v446_v59 = vld [vmem:[#allocation3 + $0x50] sm:$0xff] }
   0xd   :  { %225 = vmatpush.bf16.msra.mxu1 %v442_v10  ;;  %v367_v29 = vsel %vm104_vm7, 1.0, %v501_v24  ;;  %vm121_vm11 = vmand %vm119_vm9, %vm120_vm10  ;;  %v445_v60 = vld [vmem:[#allocation3 + $0x48] sm:$0xff]  ;;  %v444_v61 = vld [vmem:[#allocation3 + $0x40] sm:$0xff] }
   0xe   :  { %314 = vmatpush.bf16.msra.mxu2 %v450_v20  ;;  %v368_v36 = vsel %vm121_vm11, 1.0, %v501_v24  ;;  %vm138_vm14 = vmand %vm136_vm12, %vm137_vm13  ;;  %v465_v63 = vld [vmem:[%s589_s4] ss:$0 sm:$0xff] }
   0xf   :  { %112 = vperm.xlu1 %461, %v77_v8   ;;  %v369_v43 = vsel %vm138_vm14, 1.0, %v501_v24  ;;  %v348_v24 = vadd.s32 4294967288, %v557_v18 }
  0x10   :  { %95 = vperm.xlu0 %460, %v77_v8   ;;  %129 = vperm.xlu2 %462, %v77_v8  }
  0x11   :  { %226 = vmatpush.bf16.msra.mxu1 %v441_v11 }
  0x12   :  { %315 = vmatpush.bf16.msra.mxu2 %v449_v23 }
  0x15   :  { %227 = vmatpush.bf16.msra.mxu1 %v440_v12  ;;  %v467_v12 = vld [vmem:[%s590_s5] ss:$0 sm:$0xff] }
  0x16   :  { %316 = vmatpush.bf16.msra.mxu2 %v448_v28 }
  0x17   :  { %464 = vset.pattern.permute.xlu1 %v500_v9 }
  0x18   :  { %463 = vset.pattern.permute.xlu0 %v500_v9  ;;  %146 = vperm.xlu1 %464, %v77_v8   ;;  %v466_v8 = vld [vmem:[%s589_s4 + $0x1] ss:$0 sm:$0xff] }
  0x19   :  { %142 = vperm.xlu0 %463, %v76_v3   ;;  %228 = vmatpush.bf16.msra.mxu1 %v439_v13 }
  0x1a   :  { %317 = vmatpush.bf16.msra.mxu2 %v447_v58 }
  0x1d   :  { %229 = vmatpush.bf16.msra.mxu1 %v438_v14 }
  0x1e   :  { %318 = vmatpush.bf16.msra.mxu2 %v446_v59 }
  0x21   :  { %230 = vmatpush.bf16.msra.mxu1 %v437_v15 }
  0x22   :  { %319 = vmatpush.bf16.msra.mxu2 %v445_v60 }
  0x25   :  { %231 = vmatpush.bf16.msra.mxu1 %v436_v17 }
  0x26   :  { %320 = vmatpush.bf16.msra.mxu2 %v444_v61 }
  0x62   :  { %v126_v26 = vpop.permute.xlu2 %125 }
  0x63   :  { %v132_v39 = vmul.f32 %v368_v36, %v126_v26 }
  0x6a   :  { %v130_v41 = vpop.permute.xlu2 %129 }
  0x6b   :  { %v133_v48 = vmul.f32 %v368_v36, %v130_v41 }
  0x79   :  { %v109_v21 = vpop.permute.xlu1 %108 }
  0x7a   :  { %v91_v22 = vpop.permute.xlu0 %90  ;;  %v115_v34 = vmul.f32 %v367_v29, %v109_v21  ;;  %v342_v21 = vstv %s591_s6 }
  0x7b   :  { %v98_v27 = vmul.f32 %v366_v25, %v91_v22 }
  0x7d   :  { %v100_v35 = vadd.f32 %v365_v30, %v98_v27 }
  0x7f   :  { %v117_v38 = vadd.f32 %v115_v34, %v100_v35 }
  0x81   :  { %v113_v31 = vpop.permute.xlu1 %112  ;;  %v134_v47 = vadd.f32 %v132_v39, %v117_v38 }
  0x82   :  { %v96_v32 = vpop.permute.xlu0 %95  ;;  %v116_v40 = vmul.f32 %v367_v29, %v113_v31 }
  0x83   :  { %v99_v33 = vmul.f32 %v366_v25, %v96_v32 }
  0x85   :  { %v101_v37 = vadd.f32 %v365_v30, %v99_v33 }
  0x87   :  { %v118_v44 = vadd.f32 %v116_v40, %v101_v37 }
  0x89   :  { %v69_v42 = vpop.f32.mrf.mxu0  ;;  %v135_v51 = vadd.f32 %v133_v48, %v118_v44 }
  0x8a   :  { %v147_v45 = vpop.permute.xlu1 %146 }
  0x8b   :  { %v143_v46 = vpop.permute.xlu0 %142  ;;  %v150_v49 = vmul.f32 %v369_v43, %v147_v45 }
  0x8c   :  { %v149_v50 = vmul.f32 %v369_v43, %v143_v46 }
  0x8d   :  { %v152_v53 = vadd.f32 %v150_v49, %v135_v51 }
  0x8e   :  { %v151_v52 = vadd.f32 %v149_v50, %v134_v47 }
  0x90   :  { %v153_v56 = vmul.f32 %v151_v52, %v69_v42 }
  0x91   :  { %v71_v54 = vpop.f32.mrf.mxu0 }
  0x92   :  { %v154_v55 = vmul.f32 %v152_v53, %v71_v54 }
  0x94   :  { %v155_v57 = vpack.c.bf16 %v154_v55, %v153_v56 }
  0x96   :  { %232 = vmatmul.bf16.vlgmr.msra.gmra.mxu1 %v155_v57 }
 0x113   :  { %v233_v62 = vpop.f32.mrf.mxu1 }
 0x114   :  { %v234_v0 = vadd.f32 %v465_v63, %v233_v62 }
 0x116   :  { %v238_v2 = vmul.f32 0.01, %v234_v0 }
 0x118   :  { %v240_v5 = vmax.f32 %v234_v0, %v238_v2 }
 0x11b   :  { %v235_v1 = vpop.f32.mrf.mxu1 }
 0x11c   :  { %v236_v3 = vadd.f32 %v465_v63, %v235_v1 }
 0x11e   :  { %v239_v4 = vmul.f32 0.01, %v236_v3 }
 0x120   :  { %v241_v6 = vmax.f32 %v236_v3, %v239_v4 }
 0x122   :  { %v242_v7 = vpack.c.bf16 %v241_v6, %v240_v5 }
 0x124   :  { %321 = vmatmul.bf16.vlgmr.msra.gmra.mxu2 %v242_v7 }
 0x1a7   :  { %v322_v9 = vpop.f32.mrf.mxu2 }
 0x1a8   :  { %v323_v10 = vadd.f32 %v466_v8, %v322_v9 }
 0x1aa   :  { %v327_v11 = vmul.f32 0.01, %v323_v10 }
 0x1ac   :  { %v329_v13 = vmax.f32 %v323_v10, %v327_v11 }
 0x1ae   :  { %v335_v14 = vmul.f32 %v467_v12, %v329_v13 }
 0x1af   :  { %v324_v15 = vpop.f32.mrf.mxu2 }
 0x1b0   :  { %v325_v16 = vadd.f32 %v466_v8, %v324_v15  ;;  %337 = vadd.xlane.f32.xlu2 %v335_v14 }
 0x1b2   :  { %v328_v17 = vmul.f32 0.01, %v325_v16 }
 0x1b4   :  { %v330_v19 = vmax.f32 %v325_v16, %v328_v17 }
 0x1b6   :  { %v336_v20 = vmul.f32 %v467_v12, %v330_v19 }
 0x1b8   :  { %339 = vadd.xlane.f32.xlu1 %v336_v20 }
 0x223   :  { %v338_v22 = vpop.xlane.xlu2 %337 }
 0x224   :  { %v343_v23 = vadd.f32 %v342_v21, %v338_v22 }
 0x226   :  { %v347_v27 = vperm.slane %v343_v23, %v557_v18 }
 0x22b   :  { %v340_v25 = vpop.xlane.xlu1 %339 }
 0x22c   :  { %v344_v26 = vadd.f32 %v342_v21, %v340_v25 }
 0x22e   :  { %v349_v28 = vperm.slane %v344_v26, %v348_v24 }
 0x230   :  { %v351_v29 = vsel %vm350_vm15, %v349_v28, %v347_v27 }
 0x231   :  { %354 = vst.msk [vmem:[%s592_s7] sm:$0x1] %vm353_vm0, %v351_v29 }
 0x232   :  { %359 = vsyncpa [#allocation4], 1 }

</bundles_post_ra>
